<compile_context>
chip_gen: v7x
topology: tpu7x:2x2x1
jax: 0.10.0
libtpu: 0.0.40
codegen_flags: <defaults>
</compile_context>

<pallas_src>
import functools

import jax
import jax.numpy as jnp
from jax.experimental import pallas as pl
from jax.experimental.pallas import tpu as pltpu


def _round_up(x, m):
    return ((x + m - 1) // m) * m


# ----------------------------------------------------------------------------
# Fused kernel: LN(d_in) -> Linear(d_in, d_out) -> LN(d_out)
# All tensors arrive zero-padded to 128-lane multiples; the LayerNorm moments
# are computed with the *real* feature counts (padded columns are exactly 0 and
# therefore drop out of the sums; padded gamma/beta are 0 so padded output
# columns stay 0).
# ----------------------------------------------------------------------------
def _patch_encoder_kernel(x_ref, g1_ref, b1_ref, w_ref, bias_ref, g2_ref, b2_ref,
                          o_ref, *, d_in, d_out, eps):
    x = x_ref[...]                                    # (tm, Dp) f32, zero padded
    inv_in = 1.0 / d_in
    mu1 = jnp.sum(x, axis=-1, keepdims=True) * inv_in
    ex2 = jnp.sum(x * x, axis=-1, keepdims=True) * inv_in
    var1 = jnp.maximum(ex2 - mu1 * mu1, 0.0)
    xn = (x - mu1) * jax.lax.rsqrt(var1 + eps)        # EUP rsqrt
    xn = xn * g1_ref[...] + b1_ref[...]               # padded cols -> exactly 0

    # MXU matmul: bf16 operands, f32 accumulation.
    y = jnp.dot(xn.astype(jnp.bfloat16), w_ref[...],
                preferred_element_type=jnp.float32) + bias_ref[...]
    # Padded output columns are exactly 0 (zero weight cols, zero bias).
    inv_out = 1.0 / d_out
    mu2 = jnp.sum(y, axis=-1, keepdims=True) * inv_out
    ey2 = jnp.sum(y * y, axis=-1, keepdims=True) * inv_out
    var2 = jnp.maximum(ey2 - mu2 * mu2, 0.0)
    o_ref[...] = (y - mu2) * jax.lax.rsqrt(var2 + eps) * g2_ref[...] + b2_ref[...]


# ----------------------------------------------------------------------------
# Parameter packing (done once, outside the forward path)
# ----------------------------------------------------------------------------
def make_patch_encoder_params(key, patch_size, dim_emb):
    """Deterministic init matching the torch module's parameter shapes."""
    patch_dim = 3 * patch_size * patch_size
    d_out = dim_emb - 1
    kw, kb = jax.random.split(key)
    w = jax.random.normal(kw, (d_out, patch_dim), jnp.float32) / (patch_dim ** 0.5)
    b = jax.random.normal(kb, (d_out,), jnp.float32) * 0.01
    return {
        'ln1_g': jnp.ones((patch_dim,), jnp.float32),
        'ln1_b': jnp.zeros((patch_dim,), jnp.float32),
        'w': w,                      # torch Linear layout: (out, in)
        'b': b,
        'ln2_g': jnp.ones((d_out,), jnp.float32),
        'ln2_b': jnp.zeros((d_out,), jnp.float32),
    }


def pack_patch_encoder_params(params, *, lane=128):
    """Pre-transpose / pre-pad / pre-cast weights to the kernel's layout."""
    d_out, d_in = params['w'].shape
    Dp = _round_up(d_in, lane)
    Np = _round_up(d_out, lane)

    def pad_row(v, n):
        return jnp.pad(v.astype(jnp.float32), (0, n - v.shape[0])).reshape(1, n)

    w = jnp.pad(params['w'].T.astype(jnp.bfloat16),
                ((0, Dp - d_in), (0, Np - d_out)))        # (Dp, Np) bf16
    return dict(
        d_in=d_in, d_out=d_out, Dp=Dp, Np=Np,
        g1=pad_row(params['ln1_g'], Dp), b1=pad_row(params['ln1_b'], Dp),
        w=w, bias=pad_row(params['b'], Np),
        g2=pad_row(params['ln2_g'], Np), b2=pad_row(params['ln2_b'], Np),
    )


# ----------------------------------------------------------------------------
# Wrapper: tiled over rows, lane-dense padded output, slice back to real dims
# ----------------------------------------------------------------------------
def patch_encoder_apply(packed, x_flat, *, eps=1e-5, tm=256):
    M, d_in = x_flat.shape
    assert d_in == packed['d_in'], (d_in, packed['d_in'])
    Dp, Np, d_out = packed['Dp'], packed['Np'], packed['d_out']

    tm_eff = min(tm, _round_up(M, 8))
    Mp = _round_up(M, tm_eff)
    x = jnp.pad(x_flat.astype(jnp.float32), ((0, Mp - M), (0, Dp - d_in)))

    out = pl.pallas_call(
        functools.partial(_patch_encoder_kernel, d_in=d_in, d_out=d_out, eps=eps),
        out_shape=jax.ShapeDtypeStruct((Mp, Np), jnp.float32),
        grid_spec=pltpu.PrefetchScalarGridSpec(
            num_scalar_prefetch=0,
            grid=(Mp // tm_eff,),
            in_specs=[
                pl.BlockSpec((tm_eff, Dp), lambda i: (i, 0)),   # x rows
                pl.BlockSpec((1, Dp), lambda i: (0, 0)),        # ln1 gamma
                pl.BlockSpec((1, Dp), lambda i: (0, 0)),        # ln1 beta
                pl.BlockSpec((Dp, Np), lambda i: (0, 0)),       # weight (bf16)
                pl.BlockSpec((1, Np), lambda i: (0, 0)),        # bias
                pl.BlockSpec((1, Np), lambda i: (0, 0)),        # ln2 gamma
                pl.BlockSpec((1, Np), lambda i: (0, 0)),        # ln2 beta
            ],
            out_specs=pl.BlockSpec((tm_eff, Np), lambda i: (i, 0)),
        ),
        compiler_params=pltpu.CompilerParams(
            dimension_semantics=("parallel",)),
    )(x, packed['g1'], packed['b1'], packed['w'],
      packed['bias'], packed['g2'], packed['b2'])

    return out[:M, :d_out]


def patch_encoder_forward(packed, data):
    """Mirrors PatchEncoder.forward: cat(view0.patches, view1.patches, dim=1),
    Flatten(2..4), LayerNorm, Linear, LayerNorm."""
    patches = jnp.concatenate(
        [data['view0']['patches'], data['view1']['patches']], axis=1)  # (B,N2,3,p,p)
    B, N2 = patches.shape[:2]
    flat = patches.reshape(B * N2, -1)
    y = patch_encoder_apply(packed, flat)
    return y.reshape(B, N2, -1)


# ----------------------------------------------------------------------------
if __name__ == "__main__":
    B = 2
    NUM_MATCHES = 8          # patches per view
    PATCH = 4                # patch_size -> patch_dim = 3*4*4 = 48
    DIM_EMB = 32             # output feature dim = dim_emb - 1 = 31

    root = jax.random.PRNGKey(0)
    k_p0, k_p1, k_par = jax.random.split(root, 3)
    patches0 = jax.random.uniform(k_p0, (B, NUM_MATCHES, 3, PATCH, PATCH), jnp.float32)
    patches1 = jax.random.uniform(k_p1, (B, NUM_MATCHES, 3, PATCH, PATCH), jnp.float32)
    data = {'view0': {'patches': patches0}, 'view1': {'patches': patches1}}

    params = make_patch_encoder_params(k_par, PATCH, DIM_EMB)
    packed = pack_patch_encoder_params(params)

    out = patch_encoder_forward(packed, data)
    out = jax.block_until_ready(out)

    assert out.shape == (B, 2 * NUM_MATCHES, DIM_EMB - 1), out.shape
    assert bool(jnp.all(jnp.isfinite(out)))
    print("KERNEL_OK")
</pallas_src>

<mosaic_0001>
module attributes {stable_mosaic.version = 11 : i64} {
  func.func @_patch_encoder_kernel(%arg0: i32, %arg1: memref<32x128xf32, #tpu.memory_space<vmem>>, %arg2: memref<1x128xf32, #tpu.memory_space<vmem>>, %arg3: memref<1x128xf32, #tpu.memory_space<vmem>>, %arg4: memref<128x128xbf16, #tpu.memory_space<vmem>>, %arg5: memref<1x128xf32, #tpu.memory_space<vmem>>, %arg6: memref<1x128xf32, #tpu.memory_space<vmem>>, %arg7: memref<1x128xf32, #tpu.memory_space<vmem>>, %arg8: memref<32x128xf32, #tpu.memory_space<vmem>>) attributes {dimension_semantics = [#tpu.dimension_semantics<parallel>], iteration_bounds = array<i64: 1>, scalar_prefetch = 0 : i64, scratch_operands = 0 : i64, tpu.core_type = #tpu.core_type<tc>, window_params = [{transform_indices = @transform_0, window_bounds = array<i64: 32, 128>}, {pipeline_mode = #tpu.pipeline_mode<synchronous>, transform_indices = @transform_1, window_bounds = array<i64: 1, 128>}, {pipeline_mode = #tpu.pipeline_mode<synchronous>, transform_indices = @transform_2, window_bounds = array<i64: 1, 128>}, {pipeline_mode = #tpu.pipeline_mode<synchronous>, transform_indices = @transform_3, window_bounds = array<i64: 128, 128>}, {pipeline_mode = #tpu.pipeline_mode<synchronous>, transform_indices = @transform_4, window_bounds = array<i64: 1, 128>}, {pipeline_mode = #tpu.pipeline_mode<synchronous>, transform_indices = @transform_5, window_bounds = array<i64: 1, 128>}, {pipeline_mode = #tpu.pipeline_mode<synchronous>, transform_indices = @transform_6, window_bounds = array<i64: 1, 128>}, {transform_indices = @transform_7, window_bounds = array<i64: 32, 128>}]} {
    %c0 = arith.constant 0 : index
    %c0_0 = arith.constant 0 : index
    %0 = vector.load %arg1[%c0, %c0_0] : memref<32x128xf32, #tpu.memory_space<vmem>>, vector<32x128xf32>
    %cst = arith.constant dense<0.000000e+00> : vector<32xf32>
    %1 = vector.multi_reduction <add>, %0, %cst [1] : vector<32x128xf32> to vector<32xf32>
    %2 = vector.shape_cast %1 : vector<32xf32> to vector<32x1xf32>
    %cst_1 = arith.constant 0.020833334 : f32
    %3 = vector.broadcast %cst_1 : f32 to vector<32x1xf32>
    %4 = arith.mulf %2, %3 : vector<32x1xf32>
    %5 = arith.mulf %0, %0 : vector<32x128xf32>
    %cst_2 = arith.constant dense<0.000000e+00> : vector<32xf32>
    %6 = vector.multi_reduction <add>, %5, %cst_2 [1] : vector<32x128xf32> to vector<32xf32>
    %7 = vector.shape_cast %6 : vector<32xf32> to vector<32x1xf32>
    %cst_3 = arith.constant 0.020833334 : f32
    %8 = vector.broadcast %cst_3 : f32 to vector<32x1xf32>
    %9 = arith.mulf %7, %8 : vector<32x1xf32>
    %10 = arith.mulf %4, %4 : vector<32x1xf32>
    %11 = arith.subf %9, %10 : vector<32x1xf32>
    %cst_4 = arith.constant 0.000000e+00 : f32
    %12 = vector.broadcast %cst_4 : f32 to vector<32x1xf32>
    %13 = arith.maximumf %11, %12 : vector<32x1xf32>
    %14 = vector.broadcast %4 : vector<32x1xf32> to vector<32x128xf32>
    %15 = arith.subf %0, %14 : vector<32x128xf32>
    %cst_5 = arith.constant 9.99999974E-6 : f32
    %16 = vector.broadcast %cst_5 : f32 to vector<32x1xf32>
    %17 = arith.addf %13, %16 : vector<32x1xf32>
    %18 = math.rsqrt %17 : vector<32x1xf32>
    %19 = vector.broadcast %18 : vector<32x1xf32> to vector<32x128xf32>
    %20 = arith.mulf %15, %19 : vector<32x128xf32>
    %c0_6 = arith.constant 0 : index
    %c0_7 = arith.constant 0 : index
    %21 = vector.load %arg2[%c0_6, %c0_7] : memref<1x128xf32, #tpu.memory_space<vmem>>, vector<1x128xf32>
    %22 = vector.broadcast %21 : vector<1x128xf32> to vector<32x128xf32>
    %23 = arith.mulf %20, %22 : vector<32x128xf32>
    %c0_8 = arith.constant 0 : index
    %c0_9 = arith.constant 0 : index
    %24 = vector.load %arg3[%c0_8, %c0_9] : memref<1x128xf32, #tpu.memory_space<vmem>>, vector<1x128xf32>
    %25 = vector.broadcast %24 : vector<1x128xf32> to vector<32x128xf32>
    %26 = arith.addf %23, %25 : vector<32x128xf32>
    %27 = arith.truncf %26 : vector<32x128xf32> to vector<32x128xbf16>
    %c0_10 = arith.constant 0 : index
    %c0_11 = arith.constant 0 : index
    %28 = vector.load %arg4[%c0_10, %c0_11] : memref<128x128xbf16, #tpu.memory_space<vmem>>, vector<128x128xbf16>
    %cst_12 = arith.constant dense<0.000000e+00> : vector<32x128xf32>
    %29 = tpu.matmul %27, %28, %cst_12 {dimension_numbers = #tpu.dot_dimension_numbers<[1], [0], [0], [1], [0, 0, 1, 1], [], []>} : vector<32x128xbf16>, vector<128x128xbf16>, vector<32x128xf32> -> vector<32x128xf32>
    %c0_13 = arith.constant 0 : index
    %c0_14 = arith.constant 0 : index
    %30 = vector.load %arg5[%c0_13, %c0_14] : memref<1x128xf32, #tpu.memory_space<vmem>>, vector<1x128xf32>
    %31 = vector.broadcast %30 : vector<1x128xf32> to vector<32x128xf32>
    %32 = arith.addf %29, %31 : vector<32x128xf32>
    %cst_15 = arith.constant dense<0.000000e+00> : vector<32xf32>
    %33 = vector.multi_reduction <add>, %32, %cst_15 [1] : vector<32x128xf32> to vector<32xf32>
    %34 = vector.shape_cast %33 : vector<32xf32> to vector<32x1xf32>
    %cst_16 = arith.constant 0.0322580636 : f32
    %35 = vector.broadcast %cst_16 : f32 to vector<32x1xf32>
    %36 = arith.mulf %34, %35 : vector<32x1xf32>
    %37 = arith.mulf %32, %32 : vector<32x128xf32>
    %cst_17 = arith.constant dense<0.000000e+00> : vector<32xf32>
    %38 = vector.multi_reduction <add>, %37, %cst_17 [1] : vector<32x128xf32> to vector<32xf32>
    %39 = vector.shape_cast %38 : vector<32xf32> to vector<32x1xf32>
    %cst_18 = arith.constant 0.0322580636 : f32
    %40 = vector.broadcast %cst_18 : f32 to vector<32x1xf32>
    %41 = arith.mulf %39, %40 : vector<32x1xf32>
    %42 = arith.mulf %36, %36 : vector<32x1xf32>
    %43 = arith.subf %41, %42 : vector<32x1xf32>
    %cst_19 = arith.constant 0.000000e+00 : f32
    %44 = vector.broadcast %cst_19 : f32 to vector<32x1xf32>
    %45 = arith.maximumf %43, %44 : vector<32x1xf32>
    %46 = vector.broadcast %36 : vector<32x1xf32> to vector<32x128xf32>
    %47 = arith.subf %32, %46 : vector<32x128xf32>
    %cst_20 = arith.constant 9.99999974E-6 : f32
    %48 = vector.broadcast %cst_20 : f32 to vector<32x1xf32>
    %49 = arith.addf %45, %48 : vector<32x1xf32>
    %50 = math.rsqrt %49 : vector<32x1xf32>
    %51 = vector.broadcast %50 : vector<32x1xf32> to vector<32x128xf32>
    %52 = arith.mulf %47, %51 : vector<32x128xf32>
    %c0_21 = arith.constant 0 : index
    %c0_22 = arith.constant 0 : index
    %53 = vector.load %arg6[%c0_21, %c0_22] : memref<1x128xf32, #tpu.memory_space<vmem>>, vector<1x128xf32>
    %54 = vector.broadcast %53 : vector<1x128xf32> to vector<32x128xf32>
    %55 = arith.mulf %52, %54 : vector<32x128xf32>
    %c0_23 = arith.constant 0 : index
    %c0_24 = arith.constant 0 : index
    %56 = vector.load %arg7[%c0_23, %c0_24] : memref<1x128xf32, #tpu.memory_space<vmem>>, vector<1x128xf32>
    %57 = vector.broadcast %56 : vector<1x128xf32> to vector<32x128xf32>
    %58 = arith.addf %55, %57 : vector<32x128xf32>
    %c0_25 = arith.constant 0 : index
    %c0_26 = arith.constant 0 : index
    %59 = vector.load %arg8[%c0_25, %c0_26] : memref<32x128xf32, #tpu.memory_space<vmem>>, vector<32x128xf32>
    tpu.vector_store %arg8[%c0_25, %c0_26], %58 {strides = array<i32>} : memref<32x128xf32, #tpu.memory_space<vmem>>, vector<32x128xf32>,
    return
  }
  func.func @transform_0(%arg0: i32) -> (i32, i32) {
    %c0_i32 = arith.constant 0 : i32
    %c0_i32_0 = arith.constant 0 : i32
    return %arg0, %c0_i32 : i32, i32
  }
  func.func @transform_1(%arg0: i32) -> (i32, i32) {
    %c0_i32 = arith.constant 0 : i32
    %c0_i32_0 = arith.constant 0 : i32
    %c0_i32_1 = arith.constant 0 : i32
    return %c0_i32, %c0_i32_0 : i32, i32
  }
  func.func @transform_2(%arg0: i32) -> (i32, i32) {
    %c0_i32 = arith.constant 0 : i32
    %c0_i32_0 = arith.constant 0 : i32
    %c0_i32_1 = arith.constant 0 : i32
    return %c0_i32, %c0_i32_0 : i32, i32
  }
  func.func @transform_3(%arg0: i32) -> (i32, i32) {
    %c0_i32 = arith.constant 0 : i32
    %c0_i32_0 = arith.constant 0 : i32
    %c0_i32_1 = arith.constant 0 : i32
    return %c0_i32, %c0_i32_0 : i32, i32
  }
  func.func @transform_4(%arg0: i32) -> (i32, i32) {
    %c0_i32 = arith.constant 0 : i32
    %c0_i32_0 = arith.constant 0 : i32
    %c0_i32_1 = arith.constant 0 : i32
    return %c0_i32, %c0_i32_0 : i32, i32
  }
  func.func @transform_5(%arg0: i32) -> (i32, i32) {
    %c0_i32 = arith.constant 0 : i32
    %c0_i32_0 = arith.constant 0 : i32
    %c0_i32_1 = arith.constant 0 : i32
    return %c0_i32, %c0_i32_0 : i32, i32
  }
  func.func @transform_6(%arg0: i32) -> (i32, i32) {
    %c0_i32 = arith.constant 0 : i32
    %c0_i32_0 = arith.constant 0 : i32
    %c0_i32_1 = arith.constant 0 : i32
    return %c0_i32, %c0_i32_0 : i32, i32
  }
  func.func @transform_7(%arg0: i32) -> (i32, i32) {
    %c0_i32 = arith.constant 0 : i32
    %c0_i32_0 = arith.constant 0 : i32
    return %arg0, %c0_i32 : i32, i32
  }
}

</mosaic_0001>

<bundles_post_ra>
// kernel: tpu_custom_call.1
= control target key start
LH: loop header
LB: loop body
LE: loop exit
PB: predicated region body
PF: predicated region fallthrough
CT: control target
= control target key end

     0   :  { %12 = vsyncpa [#allocation3], 0  ;;  %s646_s0 = inlined_call_operand.hbm [shape: f32[32,128], index: 0, kind: input, shape index: {}]   ;;  %s647_s1 = inlined_call_operand.vmem [shape: f32[1,128], index: 1, kind: input, shape index: {}]   ;;  %s648_s2 = inlined_call_operand.vmem [shape: f32[1,128], index: 2, kind: input, shape index: {}]   ;;  %s649_s3 = inlined_call_operand.hbm [shape: bf16[128,128], index: 3, kind: input, shape index: {}]   ;;  %s650_s4 = inlined_call_operand.vmem [shape: f32[1,128], index: 4, kind: input, shape index: {}]   ;;  %s651_s5 = inlined_call_operand.vmem [shape: f32[1,128], index: 5, kind: input, shape index: {}]   ;;  %s652_s6 = inlined_call_operand.vmem [shape: f32[1,128], index: 6, kind: input, shape index: {}]   ;;  %s653_s7 = inlined_call_operand.hbm [shape: f32[32,128], index: 7, kind: output, shape index: {}]  }
   0x1   :  { %13 = vsyncpa [#allocation6], 0 }
   0x2   :  { %14 = vsyncpa [#allocation4], 0  ;;  %s506_s24 = smov [#allocation2]   ;;  %s434_s28 = scalar_lea.hbm %s646_s0, 512 }
   0x3   :  { %s20_s25 = sshll.u32 %s506_s24, 4  ;;  %p435_p0 = scmp.ne.s32.totalorder %s646_s0, %s434_s28  ;;  %s21_s25 = int_to_ptr.vmem [resolvable:$true] %s20_s25 }
   0x4   :  { %p438_p1 = scmp.lt.u32.totalorder %s434_s28, %s646_s0 }
   0x6   :  { %p440_p2 = pnand %p438_p1, %p435_p0 }
   0x8   :  { %443 = shalt.err (!%p440_p2)
}
   0x9   :  { %s444_s10 = scalar_lea.vmem %s21_s25, 512  ;;  %p449_p4 = scmp.lt.s32.totalorder %s21_s25, %s21_s25 }
   0xa   :  { %p445_p3 = scmp.ne.s32.totalorder %s21_s25, %s444_s10  ;;  %p450_p5 = scmp.lt.s32.totalorder %s444_s10, %s444_s10 }
   0xc   :  { %p451_p6 = por %p450_p5, %p449_p4 }
   0xe   :  { %p452_p7 = pnand %p451_p6, %p445_p3 }
  0x10   :  { %455 = shalt.err (!%p452_p7)
}
  0x11   :  { %s507_s11 = smov 128   ;;  %s508_s12 = smov 8  }
  0x12   :  { %26 = dma.hbm_to_vmem [thread:$0]  %s646_s0, 512, %s21_s25, [#allocation3], %s507_s11, %s507_s11, %s508_s12  }
  0x13   :  { %s509_s15 = smov [#allocation5]   ;;  %s456_s19 = scalar_lea.hbm %s649_s3, 1024 }
  0x14   :  { %s36_s16 = sshll.u32 %s509_s15, 4  ;;  %p457_p8 = scmp.ne.s32.totalorder %s649_s3, %s456_s19  ;;  %s37_s16 = int_to_ptr.vmem [resolvable:$true] %s36_s16 }
  0x15   :  { %p460_p9 = scmp.lt.u32.totalorder %s456_s19, %s649_s3 }
  0x17   :  { %p462_p10 = pnand %p460_p9, %p457_p8 }
  0x19   :  { %465 = shalt.err (!%p462_p10)
}
  0x1a   :  { %s466_s24 = scalar_lea.vmem %s37_s16, 1024  ;;  %p471_p12 = scmp.lt.s32.totalorder %s37_s16, %s37_s16 }
  0x1b   :  { %p467_p11 = scmp.ne.s32.totalorder %s37_s16, %s466_s24  ;;  %p472_p13 = scmp.lt.s32.totalorder %s466_s24, %s466_s24 }
  0x1d   :  { %p473_p0 = por %p472_p13, %p471_p12 }
  0x1f   :  { %p474_p1 = pnand %p473_p0, %p467_p11 }
  0x21   :  { %477 = shalt.err (!%p474_p1)
}
  0x22   :  { %s510_s0 = smov 64   ;;  %s511_s25 = smov 4  }
  0x23   :  { %42 = dma.hbm_to_vmem [thread:$0]  %s649_s3, 1024, %s37_s16, [#allocation6], %s510_s0, %s510_s0, %s511_s25  }
  0x24   :  { %500 = dma.done.wait [#allocation3], 512  }
  0x25   :  { %501 = vsyncadd [#allocation3], 4294966784 }
  0x26   :  { %502 = dma.done.wait [#allocation6], 1024  }
  0x27   :  { %503 = vsyncadd [#allocation6], 4294966272  ;;  %v580_v0 = vld [vmem:[#allocation2 + $0x10] sm:$0xff]  ;;  %v582_v1 = vld [vmem:[#allocation2] sm:$0xff] }
  0x28   :  { %v584_v2 = vld [vmem:[#allocation2 + $0x18] sm:$0xff]  ;;  %64 = vadd.xlane.f32.xlu1 %v580_v0  ;;  %60 = vadd.xlane.f32.xlu0 %v582_v1  ;;  %v588_v3 = vld [vmem:[#allocation2 + $0x8] sm:$0xff]  ;;  %v72_v5 = vmul.f32 %v582_v1, %v582_v1  ;;  %v74_v7 = vmul.f32 %v580_v0, %v580_v0  ;;  %v410_v8 = vld [vmem:[#allocation5] sm:$0xff]  }
  0x29   :  { %v73_v4 = vmul.f32 %v588_v3, %v588_v3  ;;  %v75_v6 = vmul.f32 %v584_v2, %v584_v2  ;;  %383 = vmatprep.subr.bf16.mxu0 %v410_v8  ;;  %v411_v9 = vld [vmem:[#allocation5 + $0x8] sm:$0xff]   ;;  %v412_v10 = vld [vmem:[#allocation5 + $0x10] sm:$0xff]   ;;  %v413_v11 = vld [vmem:[#allocation5 + $0x18] sm:$0xff]  }
  0x2a   :  { %384 = vmatpush3.bf16.msra.mxu0 %v410_v8  ;;  %v414_v12 = vld [vmem:[#allocation5 + $0x20] sm:$0xff]   ;;  %v415_v13 = vld [vmem:[#allocation5 + $0x28] sm:$0xff]   ;;  %v416_v14 = vld [vmem:[#allocation5 + $0x30] sm:$0xff]  }
  0x2b   :  { %385 = vmatprep.subr.bf16.mxu0 %v411_v9  ;;  %v417_v15 = vld [vmem:[#allocation5 + $0x38] sm:$0xff]   ;;  %v360_v51 = vld [vmem:[%s647_s1] ss:$0 sm:$0xff] }
  0x2c   :  { %66 = vadd.xlane.f32.xlu1 %v584_v2  ;;  %62 = vadd.xlane.f32.xlu0 %v588_v3  ;;  %v361_v55 = vld [vmem:[%s648_s2] ss:$0 sm:$0xff] }
  0x2e   :  { %386 = vmatpush3.bf16.msra.mxu0 %v411_v9 }
  0x2f   :  { %387 = vmatprep.subr.bf16.mxu0 %v412_v10 }
  0x30   :  { %78 = vadd.xlane.f32.xlu1 %v73_v4  ;;  %76 = vadd.xlane.f32.xlu0 %v72_v5 }
  0x32   :  { %388 = vmatpush3.bf16.msra.mxu0 %v412_v10 }
  0x33   :  { %389 = vmatprep.subr.bf16.mxu0 %v413_v11 }
  0x34   :  { %82 = vadd.xlane.f32.xlu1 %v75_v6  ;;  %80 = vadd.xlane.f32.xlu0 %v74_v7 }
  0x36   :  { %390 = vmatpush3.bf16.msra.mxu0 %v413_v11 }
  0x37   :  { %391 = vmatprep.subr.bf16.mxu0 %v414_v12 }
  0x3a   :  { %392 = vmatpush3.bf16.msra.mxu0 %v414_v12 }
  0x3b   :  { %393 = vmatprep.subr.bf16.mxu0 %v415_v13 }
  0x3e   :  { %394 = vmatpush3.bf16.msra.mxu0 %v415_v13 }
  0x3f   :  { %395 = vmatprep.subr.bf16.mxu0 %v416_v14 }
  0x42   :  { %396 = vmatpush3.bf16.msra.mxu0 %v416_v14 }
  0x43   :  { %397 = vmatprep.subr.bf16.mxu0 %v417_v15 }
  0x46   :  { %398 = vmatpush3.bf16.msra.mxu0 %v417_v15 }
  0xb5   :  { %v65_v16 = vpop.xlane.xlu1 %64  ;;  %v61_v17 = vpop.xlane.xlu0 %60 }
  0xb6   :  { %v68_v20 = vmul.f32 0.020833334, %v61_v17  ;;  %v70_v22 = vmul.f32 0.020833334, %v65_v16 }
  0xb8   :  { %v88_v26 = vmul.f32 %v68_v20, %v68_v20  ;;  %v90_v32 = vmul.f32 %v70_v22, %v70_v22  ;;  %v100_v50 = vsub.f32 %v582_v1, %v68_v20  ;;  %v102_v59 = vsub.f32 %v580_v0, %v70_v22 }
  0xb9   :  { %v67_v18 = vpop.xlane.xlu1 %66  ;;  %v63_v19 = vpop.xlane.xlu0 %62 }
  0xba   :  { %v69_v21 = vmul.f32 0.020833334, %v63_v19  ;;  %v71_v23 = vmul.f32 0.020833334, %v67_v18 }
  0xbc   :  { %v89_v27 = vmul.f32 %v69_v21, %v69_v21  ;;  %v91_v33 = vmul.f32 %v71_v23, %v71_v23  ;;  %v101_v48 = vsub.f32 %v588_v3, %v69_v21  ;;  %v103_v56 = vsub.f32 %v584_v2, %v71_v23  ;;  %v362_v2 = vld [vmem:[%s650_s4] ss:$0 sm:$0xff] }
  0xbd   :  { %v79_v24 = vpop.xlane.xlu1 %78  ;;  %v77_v25 = vpop.xlane.xlu0 %76 }
  0xbe   :  { %v85_v28 = vmul.f32 0.020833334, %v79_v24  ;;  %v84_v29 = vmul.f32 0.020833334, %v77_v25 }
  0xc0   :  { %v93_v30 = vsub.f32 %v85_v28, %v89_v27  ;;  %v92_v31 = vsub.f32 %v84_v29, %v88_v26 }
  0xc1   :  { %v83_v34 = vpop.xlane.xlu1 %82  ;;  %v81_v35 = vpop.xlane.xlu0 %80 }
  0xc2   :  { %v97_v36 = vmax.f32 %v93_v30, 0.0  ;;  %v96_v37 = vmax.f32 %v92_v31, 0.0  ;;  %v87_v38 = vmul.f32 0.020833334, %v83_v34  ;;  %v86_v39 = vmul.f32 0.020833334, %v81_v35 }
  0xc4   :  { %v105_v40 = vadd.f32 1e-05, %v97_v36  ;;  %v104_v41 = vadd.f32 1e-05, %v96_v37  ;;  %v95_v42 = vsub.f32 %v87_v38, %v91_v33  ;;  %v94_v43 = vsub.f32 %v86_v39, %v90_v32 }
  0xc6   :  { %418 = vrsqrt.f32 %v105_v40  ;;  %v99_v44 = vmax.f32 %v95_v42, 0.0  ;;  %v98_v45 = vmax.f32 %v94_v43, 0.0 }
  0xc7   :  { %420 = vrsqrt.f32 %v104_v41 }
  0xc8   :  { %v107_v46 = vadd.f32 1e-05, %v99_v44  ;;  %v106_v47 = vadd.f32 1e-05, %v98_v45 }
  0xca   :  { %422 = vrsqrt.f32 %v107_v46 }
  0xcb   :  { %424 = vrsqrt.f32 %v106_v47 }
  0xd0   :  { %v419_v49 = vpop.eup %418 }
  0xd1   :  { %v421_v52 = vpop.eup %420  ;;  %v113_v53 = vmul.f32 %v419_v49, %v101_v48 }
  0xd2   :  { %v112_v54 = vmul.f32 %v421_v52, %v100_v50 }
  0xd3   :  { %v124_v57 = vmul.f32 %v360_v51, %v113_v53 }
  0xd4   :  { %v423_v58 = vpop.eup %422  ;;  %v123_v60 = vmul.f32 %v360_v51, %v112_v54 }
  0xd5   :  { %v425_v61 = vpop.eup %424  ;;  %v135_v62 = vadd.f32 %v361_v55, %v124_v57  ;;  %v115_v63 = vmul.f32 %v423_v58, %v103_v56 }
  0xd6   :  { %v134_v1 = vadd.f32 %v361_v55, %v123_v60  ;;  %v114_v3 = vmul.f32 %v425_v61, %v102_v59  ;;  %v372_v59 = vld [vmem:[%s652_s6] ss:$0 sm:$0xff] }
  0xd7   :  { %v126_v4 = vmul.f32 %v360_v51, %v115_v63 }
  0xd8   :  { %v138_v5 = vpack.c.bf16 %v135_v62, %v134_v1  ;;  %v125_v6 = vmul.f32 %v360_v51, %v114_v3 }
  0xd9   :  { %v137_v7 = vadd.f32 %v361_v55, %v126_v4 }
  0xda   :  { %399 = vmatprep.mubr.bf16.mxu0 %v138_v5  ;;  %v136_v8 = vadd.f32 %v361_v55, %v125_v6  ;;  %v371_v55 = vld [vmem:[%s651_s5] ss:$0 sm:$0xff]  ;;  %s512_s5 = smov [#allocation7]  }
  0xdb   :  { %s347_s13 = sshll.u32 %s512_s5, 4  ;;  %s348_s13 = int_to_ptr.vmem [resolvable:$true] %s347_s13 }
  0xdc   :  { %v139_v9 = vpack.c.bf16 %v137_v7, %v136_v8  ;;  %s478_s6 = scalar_lea.vmem %s348_s13, 512  ;;  %p483_p3 = scmp.lt.s32.totalorder %s348_s13, %s348_s13 }
  0xdd   :  { %p479_p2 = scmp.ne.s32.totalorder %s348_s13, %s478_s6  ;;  %p484_p4 = scmp.lt.s32.totalorder %s478_s6, %s478_s6 }
  0xde   :  { %400 = vmatmul.mubr.bf16.vlgmr.msra.gmra.mrb[0].mxu0 %v139_v9 }
  0xdf   :  { %p485_p5 = por %p484_p4, %p483_p3 }
  0xe1   :  { %p486_p6 = pnand %p485_p5, %p479_p2 }
 0x1b1   :  { %v401_v10 = vpop.f32.mrb[0].mxu0 }
 0x1b2   :  { %v613_v0 = vadd.f32 %v401_v10, %v362_v2  ;;  %v245_v11 = vpop.f32.mrb[1].mxu0 }
 0x1b3   :  { %v402_v12 = vpop.f32.mrb[2].mxu0  ;;  %v246_v15 = vadd.f32 %v362_v2, %v245_v11 }
 0x1b4   :  { %v615_v13 = vadd.f32 %v402_v12, %v362_v2  ;;  %264 = vadd.xlane.f32.xlu0 %v613_v0  ;;  %v248_v14 = vpop.f32.mrb[3].mxu0  ;;  %v274_v19 = vmul.f32 %v613_v0, %v613_v0 }
 0x1b5   :  { %v249_v16 = vadd.f32 %v362_v2, %v248_v14  ;;  %v272_v17 = vmul.f32 %v246_v15, %v246_v15 }
 0x1b6   :  { %266 = vadd.xlane.f32.xlu1 %v615_v13  ;;  %v275_v20 = vmul.f32 %v615_v13, %v615_v13 }
 0x1b7   :  { %v273_v18 = vmul.f32 %v249_v16, %v249_v16 }
 0x1b8   :  { %260 = vadd.xlane.f32.xlu0 %v246_v15 }
 0x1ba   :  { %262 = vadd.xlane.f32.xlu1 %v249_v16 }
 0x1bc   :  { %276 = vadd.xlane.f32.xlu0 %v272_v17 }
 0x1be   :  { %278 = vadd.xlane.f32.xlu1 %v273_v18 }
 0x1c0   :  { %280 = vadd.xlane.f32.xlu0 %v274_v19 }
 0x1c2   :  { %282 = vadd.xlane.f32.xlu1 %v275_v20 }
 0x241   :  { %v265_v21 = vpop.xlane.xlu0 %264 }
 0x242   :  { %v270_v28 = vmul.f32 0.032258064, %v265_v21 }
 0x243   :  { %v267_v22 = vpop.xlane.xlu1 %266 }
 0x244   :  { %v271_v31 = vmul.f32 0.032258064, %v267_v22  ;;  %v290_v37 = vmul.f32 %v270_v28, %v270_v28  ;;  %v302_v60 = vsub.f32 %v613_v0, %v270_v28 }
 0x245   :  { %v261_v23 = vpop.xlane.xlu0 %260 }
 0x246   :  { %v268_v24 = vmul.f32 0.032258064, %v261_v23  ;;  %v291_v41 = vmul.f32 %v271_v31, %v271_v31  ;;  %v303_v1 = vsub.f32 %v615_v13, %v271_v31 }
 0x247   :  { %v263_v25 = vpop.xlane.xlu1 %262 }
 0x248   :  { %v269_v26 = vmul.f32 0.032258064, %v263_v25  ;;  %v288_v29 = vmul.f32 %v268_v24, %v268_v24  ;;  %v300_v53 = vsub.f32 %v246_v15, %v268_v24 }
 0x249   :  { %v277_v27 = vpop.xlane.xlu0 %276 }
 0x24a   :  { %v284_v30 = vmul.f32 0.032258064, %v277_v27  ;;  %v289_v33 = vmul.f32 %v269_v26, %v269_v26  ;;  %v301_v56 = vsub.f32 %v249_v16, %v269_v26 }
 0x24b   :  { %v279_v32 = vpop.xlane.xlu1 %278 }
 0x24c   :  { %v292_v34 = vsub.f32 %v284_v30, %v288_v29  ;;  %v285_v35 = vmul.f32 0.032258064, %v279_v32 }
 0x24d   :  { %v281_v36 = vpop.xlane.xlu0 %280 }
 0x24e   :  { %v296_v38 = vmax.f32 %v292_v34, 0.0  ;;  %v293_v39 = vsub.f32 %v285_v35, %v289_v33  ;;  %v286_v40 = vmul.f32 0.032258064, %v281_v36 }
 0x24f   :  { %v283_v42 = vpop.xlane.xlu1 %282 }
 0x250   :  { %v304_v43 = vadd.f32 1e-05, %v296_v38  ;;  %v297_v44 = vmax.f32 %v293_v39, 0.0  ;;  %v294_v45 = vsub.f32 %v286_v40, %v290_v37  ;;  %v287_v46 = vmul.f32 0.032258064, %v283_v42 }
 0x252   :  { %426 = vrsqrt.f32 %v304_v43  ;;  %v305_v47 = vadd.f32 1e-05, %v297_v44  ;;  %v298_v48 = vmax.f32 %v294_v45, 0.0  ;;  %v295_v49 = vsub.f32 %v287_v46, %v291_v41 }
 0x254   :  { %428 = vrsqrt.f32 %v305_v47  ;;  %v306_v50 = vadd.f32 1e-05, %v298_v48  ;;  %v299_v51 = vmax.f32 %v295_v49, 0.0 }
 0x256   :  { %430 = vrsqrt.f32 %v306_v50  ;;  %v307_v52 = vadd.f32 1e-05, %v299_v51 }
 0x258   :  { %432 = vrsqrt.f32 %v307_v52 }
 0x25c   :  { %v427_v54 = vpop.eup %426 }
 0x25d   :  { %v312_v57 = vmul.f32 %v427_v54, %v300_v53 }
 0x25e   :  { %v429_v58 = vpop.eup %428 }
 0x25f   :  { %v313_v61 = vmul.f32 %v429_v58, %v301_v56  ;;  %v323_v62 = vmul.f32 %v371_v55, %v312_v57 }
 0x260   :  { %v431_v63 = vpop.eup %430 }
 0x261   :  { %v314_v3 = vmul.f32 %v431_v63, %v302_v60  ;;  %v324_v4 = vmul.f32 %v371_v55, %v313_v61  ;;  %v334_v5 = vadd.f32 %v372_v59, %v323_v62 }
 0x262   :  { %v433_v6 = vpop.eup %432 }
 0x263   :  { %v315_v7 = vmul.f32 %v433_v6, %v303_v1  ;;  %v325_v8 = vmul.f32 %v371_v55, %v314_v3  ;;  %v335_v9 = vadd.f32 %v372_v59, %v324_v4  ;;  %338 = vst [vmem:[#allocation7] sm:$0xff] %v334_v5 }
 0x265   :  { %v326_v2 = vmul.f32 %v371_v55, %v315_v7  ;;  %v336_v10 = vadd.f32 %v372_v59, %v325_v8  ;;  %339 = vst [vmem:[#allocation7 + $0x8] sm:$0xff] %v335_v9 }
 0x267   :  { %v337_v11 = vadd.f32 %v372_v59, %v326_v2  ;;  %340 = vst [vmem:[#allocation7 + $0x10] sm:$0xff] %v336_v10 }
 0x269   :  { %341 = vst [vmem:[#allocation7 + $0x18] sm:$0xff] %v337_v11 }
 0x26a   :  { %489 = shalt.err (!%p486_p6)
}
 0x26b   :  { %s490_s16 = scalar_lea.hbm %s653_s7, 512 }
 0x26c   :  { %p491_p7 = scmp.ne.s32.totalorder %s653_s7, %s490_s16  ;;  %p494_p8 = scmp.lt.u32.totalorder %s490_s16, %s653_s7 }
 0x26e   :  { %p496_p9 = pnand %p494_p8, %p491_p7 }
 0x270   :  { %499 = shalt.err (!%p496_p9)
}
 0x271   :  { %353 = dma.vmem_to_hbm [thread:$0]  %s348_s13, 512, %s653_s7, [#allocation4], %s507_s11, %s507_s11, %s508_s12  }
 0x272   :  { %504 = dma.done.wait [#allocation4], 512  }
 0x273   :  { %505 = vsyncadd [#allocation4], 4294966784 }
 0x274   :  { %357 = vsyncpa [#allocation3], 1 }
 0x275   :  { %358 = vsyncpa [#allocation6], 1 }
 0x276   :  { %359 = vsyncpa [#allocation4], 1 }

</bundles_post_ra>
